<compile_context>
chip_gen: v7x
topology: tpu7x:2x2x1
jax: 0.10.0
libtpu: 0.0.40
codegen_flags: <defaults>
</compile_context>

<pallas_src>
import functools

import jax
import jax.numpy as jnp
from jax import lax
from jax.experimental import pallas as pl
from jax.experimental.pallas import tpu as pltpu


def _round_up(x, m):
    return (x + m - 1) // m * m


def _prep_kernel(xa_ref, waug_ref, a12p_ref, hpad_ref, s12_ref):
    # h_pad = [x | 1] @ W_aug  -> h in lanes [0,fout), 1.0 at lane fout, 0 after
    hp = jnp.dot(xa_ref[...], waug_ref[...], preferred_element_type=jnp.float32)
    # TODO(synk): F.dropout(h, p) omitted (inference semantics; no clean
    #             deterministic equivalent of torch's training-mode RNG).
    hpad_ref[...] = hp
    # fused score mat-vec: s12[:, 0] = h @ a[:F], s12[:, 1] = h @ a[F:]
    # (rows >= fout of a12p are zero, so padding / ones column never contribute)
    s12_ref[...] = jnp.dot(hp, a12p_ref[...], preferred_element_type=jnp.float32)


def _gat_tile_kernel(adj_ref, hpad_ref, s1_ref, s2_ref, out_ref, acc_ref,
                     *, alpha, concat, fout):
    j = pl.program_id(1)

    @pl.when(j == 0)
    def _():
        acc_ref[...] = jnp.zeros_like(acc_ref)

    # score_ij = a[:F].h_i + a[F:].h_j ; s1 is (tm, 1), s2 is (1, tn)
    score = s1_ref[...] + s2_ref[...]                          # (tm, tn) VPU
    # -leakyrelu(score) == min(-score, -alpha*score) for 0 < alpha < 1
    neg_lrelu = jnp.minimum(-score, -alpha * score)
    # TODO(synk): exp() is unbounded for strongly negative scores; the torch
    #             reference runs in f64 so extreme inputs could overflow f32.
    e = jnp.exp(neg_lrelu) * adj_ref[...].astype(jnp.float32)  # EUP exp + VPU mask
    # one accumulator covers numerator AND rowsum (ones column of h_pad)
    acc_ref[...] += jnp.dot(e, hpad_ref[...].astype(jnp.float32),
                            preferred_element_type=jnp.float32)

    @pl.when(j == pl.num_programs(1) - 1)
    def _():
        acc = acc_ref[...]
        rowsum = acc[:, fout:fout + 1]                         # (tm, 1)
        r = pl.reciprocal(rowsum, approx=True)                 # EUP
        r = r * (2.0 - rowsum * r)                             # Newton -> ~f32 exact
        hp = acc * r
        if concat:
            hp = jnp.where(hp > 0, hp, jnp.exp(hp) - 1.0)      # F.elu
        out_ref[...] = hp.astype(out_ref.dtype)                # lane-dense store


def _pick_tiles(N):
    """Adaptive tile sizes: biggest adj tile that comfortably fits VMEM while
    keeping n_pad (and hence padded HBM traffic) close to N."""
    if N <= 1024:
        tm = tn = _round_up(N, 128)
        n_pad = tm
    else:
        n_pad = _round_up(N, 512)
        tm = 512
        k = n_pad // 512
        d = max(dd for dd in (4, 2, 1) if k % dd == 0)   # tn divides n_pad
        tn = 512 * d                                     # up to 2048 cols/tile
    return tm, tn, n_pad


def sp_graph_attention_layer(x, adj, W, a, *, alpha=0.2, concat=True,
                             dropout=0.0, adj_dtype=jnp.float32):
    """Pallas-backed forward of SpGraphAttentionLayer (eval mode)."""
    del dropout  # inference-only (see TODO in _prep_kernel)
    N, fin = x.shape
    fout = W.shape[1]
    FP = _round_up(fout + 1, 128)        # lane-dense width (+1 for ones column)

    tm, tn, n_pad = _pick_tiles(N)

    f32 = jnp.float32
    x_p = jnp.pad(x.astype(f32), ((0, n_pad - N), (0, 0)))
    # [x | 1]: the ones column flows through the matmul into lane `fout`
    x_aug = jnp.concatenate([x_p, jnp.ones((n_pad, 1), f32)], axis=1)
    # adj can be streamed in a narrower dtype (e.g. bf16) to halve HBM traffic;
    # default f32 keeps edge weights exact vs the reference.
    adj_p = jnp.pad(adj.astype(adj_dtype), ((0, n_pad - N), (0, n_pad - N)))

    w_aug = jnp.zeros((fin + 1, FP), f32)
    w_aug = w_aug.at[:fin, :fout].set(W.astype(f32))
    w_aug = w_aug.at[fin, fout].set(1.0)                               # ones column
    a12 = jnp.stack([a[0, :fout], a[0, fout:]], axis=1).astype(f32)    # (fout, 2)
    a12_p = jnp.zeros((FP, 2), f32).at[:fout, :].set(a12)

    # ---- prep: h_pad (with ones column) + both score halves, one pass -------
    h_pad, s12 = pl.pallas_call(
        _prep_kernel,
        out_shape=(jax.ShapeDtypeStruct((n_pad, FP), f32),
                   jax.ShapeDtypeStruct((n_pad, 2), f32)),
        grid=(n_pad // tm,),
        in_specs=[pl.BlockSpec((tm, fin + 1), lambda i: (i, 0)),
                  pl.BlockSpec((fin + 1, FP), lambda i: (0, 0)),
                  pl.BlockSpec((FP, 2), lambda i: (0, 0))],
        out_specs=(pl.BlockSpec((tm, FP), lambda i: (i, 0)),
                   pl.BlockSpec((tm, 2), lambda i: (i, 0))),
        compiler_params=pltpu.CompilerParams(
            dimension_semantics=("parallel",)),
    )(x_aug, w_aug, a12_p)

    s1 = s12[:, 0:1]           # (n_pad, 1)  row term of the edge score
    s2_row = s12[:, 1:2].T     # (1, n_pad)  col term, transposed ONCE (not per tile)

    # ---- main: stream adj tiles, accumulate e @ h_pad ------------------------
    out_full = pl.pallas_call(
        functools.partial(_gat_tile_kernel, alpha=alpha, concat=concat, fout=fout),
        out_shape=jax.ShapeDtypeStruct((n_pad, FP), f32),
        grid=(n_pad // tm, n_pad // tn),
        in_specs=[pl.BlockSpec((tm, tn), lambda i, j: (i, j)),   # adj tile
                  pl.BlockSpec((tn, FP), lambda i, j: (j, 0)),   # h_pad rows (col block)
                  pl.BlockSpec((tm, 1), lambda i, j: (i, 0)),    # s1 (row block)
                  pl.BlockSpec((1, tn), lambda i, j: (0, j))],   # s2 (col block)
        out_specs=pl.BlockSpec((tm, FP), lambda i, j: (i, 0)),
        scratch_shapes=[pltpu.VMEM((tm, FP), f32)],
        compiler_params=pltpu.CompilerParams(
            dimension_semantics=("parallel", "arbitrary"),   # row blocks shard across TCs
            vmem_limit_bytes=40 * 1024 * 1024),
    )(adj_p, h_pad, s1, s2_row)

    return out_full[:N, :fout]


def _reference(x, adj, W, a, *, alpha=0.2, concat=True):
    """Pure-JAX dense reference mirroring the PyTorch forward (eval mode)."""
    h = x @ W
    fout = W.shape[1]
    s1 = h @ a[0, :fout]
    s2 = h @ a[0, fout:]
    score = s1[:, None] + s2[None, :]
    lrelu = jnp.where(score > 0, score, alpha * score)
    e = jnp.exp(-lrelu) * adj
    rowsum = e.sum(axis=1, keepdims=True)
    h_prime = (e @ h) / rowsum
    if concat:
        h_prime = jnp.where(h_prime > 0, h_prime, jnp.exp(h_prime) - 1.0)
    return h_prime


if __name__ == "__main__":
    N, in_features, out_features = 16, 8, 32
    alpha = 0.2

    key = jax.random.PRNGKey(0)
    kx, kadj, kw, ka = jax.random.split(key, 4)

    # Node features
    x = jax.random.normal(kx, (N, in_features), dtype=jnp.float32)

    # Random weighted adjacency with self-loops (every row has >=1 edge)
    mask = (jax.random.uniform(kadj, (N, N)) < 0.3).astype(jnp.float32)
    weights = jax.random.uniform(kadj, (N, N), minval=0.5, maxval=1.5)
    adj = mask * weights + jnp.eye(N, dtype=jnp.float32)

    # Xavier-normal init, gain=1.414 (matches shapes in __init__)
    gain = 1.414
    std_W = gain * (2.0 / (in_features + out_features)) ** 0.5
    std_a = gain * (2.0 / (1 + 2 * out_features)) ** 0.5
    W = std_W * jax.random.normal(kw, (in_features, out_features), dtype=jnp.float32)
    a = std_a * jax.random.normal(ka, (1, 2 * out_features), dtype=jnp.float32)

    out = sp_graph_attention_layer(x, adj, W, a, alpha=alpha, concat=True)
    out = jax.block_until_ready(out)

    ref = _reference(x, adj, W, a, alpha=alpha, concat=True)
    assert out.shape == (N, out_features)
    assert bool(jnp.all(jnp.isfinite(out)))
    assert bool(jnp.allclose(out, ref, rtol=1e-4, atol=1e-4)), \
        float(jnp.max(jnp.abs(out - ref)))

    print("KERNEL_OK")
</pallas_src>

<mosaic_0001>
module attributes {stable_mosaic.version = 11 : i64} {
  func.func @_prep_kernel(%arg0: i32, %arg1: memref<128x9xf32, #tpu.memory_space<vmem>>, %arg2: memref<9x128xf32, #tpu.memory_space<vmem>>, %arg3: memref<128x2xf32, #tpu.memory_space<vmem>>, %arg4: memref<128x128xf32, #tpu.memory_space<vmem>>, %arg5: memref<128x2xf32, #tpu.memory_space<vmem>>) attributes {dimension_semantics = [#tpu.dimension_semantics<parallel>], iteration_bounds = array<i64: 1>, scalar_prefetch = 0 : i64, scratch_operands = 0 : i64, tpu.core_type = #tpu.core_type<tc>, window_params = [{transform_indices = @transform_0, window_bounds = array<i64: 128, 9>}, {pipeline_mode = #tpu.pipeline_mode<synchronous>, transform_indices = @transform_1, window_bounds = array<i64: 9, 128>}, {pipeline_mode = #tpu.pipeline_mode<synchronous>, transform_indices = @transform_2, window_bounds = array<i64: 128, 2>}, {transform_indices = @transform_3, window_bounds = array<i64: 128, 128>}, {transform_indices = @transform_4, window_bounds = array<i64: 128, 2>}]} {
    %c0 = arith.constant 0 : index
    %c0_0 = arith.constant 0 : index
    %0 = vector.load %arg1[%c0, %c0_0] : memref<128x9xf32, #tpu.memory_space<vmem>>, vector<128x9xf32>
    %c0_1 = arith.constant 0 : index
    %c0_2 = arith.constant 0 : index
    %1 = vector.load %arg2[%c0_1, %c0_2] : memref<9x128xf32, #tpu.memory_space<vmem>>, vector<9x128xf32>
    %cst = arith.constant dense<0.000000e+00> : vector<128x128xf32>
    %2 = tpu.matmul %0, %1, %cst {dimension_numbers = #tpu.dot_dimension_numbers<[1], [0], [0], [1], [0, 0, 1, 1], [], []>} : vector<128x9xf32>, vector<9x128xf32>, vector<128x128xf32> -> vector<128x128xf32>
    %c0_3 = arith.constant 0 : index
    %c0_4 = arith.constant 0 : index
    %3 = vector.load %arg4[%c0_3, %c0_4] : memref<128x128xf32, #tpu.memory_space<vmem>>, vector<128x128xf32>
    tpu.vector_store %arg4[%c0_3, %c0_4], %2 {strides = array<i32>} : memref<128x128xf32, #tpu.memory_space<vmem>>, vector<128x128xf32>,
    %c0_5 = arith.constant 0 : index
    %c0_6 = arith.constant 0 : index
    %4 = vector.load %arg3[%c0_5, %c0_6] : memref<128x2xf32, #tpu.memory_space<vmem>>, vector<128x2xf32>
    %cst_7 = arith.constant dense<0.000000e+00> : vector<128x2xf32>
    %5 = tpu.matmul %2, %4, %cst_7 {dimension_numbers = #tpu.dot_dimension_numbers<[1], [0], [0], [1], [0, 0, 1, 1], [], []>} : vector<128x128xf32>, vector<128x2xf32>, vector<128x2xf32> -> vector<128x2xf32>
    %c0_8 = arith.constant 0 : index
    %c0_9 = arith.constant 0 : index
    %6 = vector.load %arg5[%c0_8, %c0_9] : memref<128x2xf32, #tpu.memory_space<vmem>>, vector<128x2xf32>
    tpu.vector_store %arg5[%c0_8, %c0_9], %5 {strides = array<i32>} : memref<128x2xf32, #tpu.memory_space<vmem>>, vector<128x2xf32>,
    return
  }
  func.func @transform_0(%arg0: i32) -> (i32, i32) {
    %c0_i32 = arith.constant 0 : i32
    %c0_i32_0 = arith.constant 0 : i32
    return %arg0, %c0_i32 : i32, i32
  }
  func.func @transform_1(%arg0: i32) -> (i32, i32) {
    %c0_i32 = arith.constant 0 : i32
    %c0_i32_0 = arith.constant 0 : i32
    %c0_i32_1 = arith.constant 0 : i32
    return %c0_i32, %c0_i32_0 : i32, i32
  }
  func.func @transform_2(%arg0: i32) -> (i32, i32) {
    %c0_i32 = arith.constant 0 : i32
    %c0_i32_0 = arith.constant 0 : i32
    %c0_i32_1 = arith.constant 0 : i32
    return %c0_i32, %c0_i32_0 : i32, i32
  }
  func.func @transform_3(%arg0: i32) -> (i32, i32) {
    %c0_i32 = arith.constant 0 : i32
    %c0_i32_0 = arith.constant 0 : i32
    return %arg0, %c0_i32 : i32, i32
  }
  func.func @transform_4(%arg0: i32) -> (i32, i32) {
    %c0_i32 = arith.constant 0 : i32
    %c0_i32_0 = arith.constant 0 : i32
    return %arg0, %c0_i32 : i32, i32
  }
}

</mosaic_0001>

<bundles_post_ra>
// kernel: tpu_custom_call.1
= control target key start
LH: loop header
LB: loop body
LE: loop exit
PB: predicated region body
PF: predicated region fallthrough
CT: control target
= control target key end

     0   :  { %vm84_vm0 = vcmask 1040384   ;;  %vm680_vm1 = vmmov 1   ;;  %vm35_vm3 = vcmask 72704   ;;  %s903_s0 = inlined_call_operand.vmem [shape: f32[128,9], index: 0, kind: input, shape index: {}]   ;;  %s904_s1 = inlined_call_operand.vmem [shape: f32[9,128], index: 1, kind: input, shape index: {}]   ;;  %s905_s2 = inlined_call_operand.vmem [shape: f32[128,2], index: 2, kind: input, shape index: {}]   ;;  %s906_s3 = inlined_call_operand.hbm [shape: f32[128,128], index: 3, kind: output, shape index: {0}]   ;;  %s907_s4 = inlined_call_operand.vmem [shape: f32[128,2], index: 4, kind: output, shape index: {1}]  }
   0x1   :  { %v33_v0 = vld [vmem:[%s904_s1] sm:$0xff]  ;;  %v34_v1 = vld [vmem:[%s904_s1 + $0x8] sm:$0x1]  ;;  %vm599_vm2 = vmpackc.low %vm84_vm0, %vm680_vm1 }
   0x2   :  { %v17_v2 = vld [vmem:[%s903_s0] sm:$0xff]  ;;  %v598_v3 = vpack.c.bf16 %v34_v1, %v33_v0  ;;  %v18_v4 = vld [vmem:[%s903_s0 + $0x8] sm:$0xff]  ;;  %v19_v5 = vld [vmem:[%s903_s0 + $0x10] sm:$0xff] }
   0x3   :  { %518 = vmatprep.mubr.msk.f32.mxu0 %vm35_vm3, %v17_v2  ;;  %v249_v6 = vld [vmem:[%s905_s2] sm:$0xff]  ;;  %v250_v7 = vld [vmem:[%s905_s2 + $0x8] sm:$0xff]  ;;  %v251_v9 = vld [vmem:[%s905_s2 + $0x10] sm:$0xff] }
   0x4   :  { %600 = vmatprep.subr.msk.bf16.mxu0 %vm599_vm2, %v598_v3  ;;  %v604_v8 = vpack.c.bf16 %v250_v7, %v249_v6  ;;  %v252_v10 = vld [vmem:[%s905_s2 + $0x18] sm:$0xff]  ;;  %v253_v13 = vld [vmem:[%s905_s2 + $0x20] sm:$0xff]  ;;  %v254_v14 = vld [vmem:[%s905_s2 + $0x28] sm:$0xff] }
   0x5   :  { %603 = vmatpush3.bf16.msk.msra.mxu0 %vm599_vm2, %v598_v3  ;;  %v20_v11 = vld [vmem:[%s903_s0 + $0x18] sm:$0xff]  ;;  %v608_v12 = vpack.c.bf16 %v252_v10, %v251_v9  ;;  %v21_v15 = vld [vmem:[%s903_s0 + $0x20] sm:$0xff]  ;;  %v612_v16 = vpack.c.bf16 %v254_v14, %v253_v13 }
   0x6   :  { %605 = vmatprep.subr.bf16.mxu0 %v604_v8  ;;  %636 = vmatprep.subr.bf16.mxu1 %v604_v8 }
   0x7   :  { %644 = vmatpush3.bf16.msra.mxu1 %v604_v8 }
   0x8   :  { %519 = vmatmul.mubr.msk.f32.vlgmr.msra.gmra.mrb[0].mxu0 %vm35_vm3, %v18_v4 }
   0x9   :  { %521 = vmatprep.mubr.msk.f32.mxu0 %vm35_vm3, %v19_v5  ;;  %607 = vmatpush3.bf16.msra.mxu0 %v604_v8 }
   0xa   :  { %609 = vmatprep.subr.bf16.mxu0 %v608_v12 }
   0xc   :  { %522 = vmatmul.mubr.msk.f32.gmra.mrb[2].mxu0 %vm35_vm3, %v20_v11 }
   0xd   :  { %10 = vsyncpa [#allocation3], 0  ;;  %524 = vmatprep.mubr.msk.f32.mxu0 %vm35_vm3, %v21_v15  ;;  %v22_v17 = vld [vmem:[%s903_s0 + $0x28] sm:$0xff]  ;;  %v255_v18 = vld [vmem:[%s905_s2 + $0x30] sm:$0xff]  ;;  %637 = vmatprep.subr.bf16.mxu1 %v608_v12 }
   0xe   :  { %v256_v19 = vld [vmem:[%s905_s2 + $0x38] sm:$0xff]  ;;  %v23_v20 = vld [vmem:[%s903_s0 + $0x30] sm:$0xff]  ;;  %611 = vmatpush3.bf16.msra.mxu0 %v608_v12  ;;  %645 = vmatpush3.bf16.msra.mxu1 %v608_v12  ;;  %v257_v23 = vld [vmem:[%s905_s2 + $0x40] sm:$0xff] }
   0xf   :  { %613 = vmatprep.subr.bf16.mxu0 %v612_v16  ;;  %v616_v21 = vpack.c.bf16 %v256_v19, %v255_v18  ;;  %v24_v22 = vld [vmem:[%s903_s0 + $0x38] sm:$0xff]  ;;  %v258_v24 = vld [vmem:[%s905_s2 + $0x48] sm:$0xff]  ;;  %638 = vmatprep.subr.bf16.mxu1 %v612_v16  ;;  %v25_v25 = vld [vmem:[%s903_s0 + $0x40] sm:$0xff] }
  0x10   :  { %525 = vmatmul.mubr.msk.f32.gmra.mrb[4].mxu0 %vm35_vm3, %v22_v17  ;;  %v620_v26 = vpack.c.bf16 %v258_v24, %v257_v23  ;;  %v26_v27 = vld [vmem:[%s903_s0 + $0x48] sm:$0xff]  ;;  %v259_v28 = vld [vmem:[%s905_s2 + $0x50] sm:$0xff]  ;;  %v260_v29 = vld [vmem:[%s905_s2 + $0x58] sm:$0xff] }
  0x11   :  { %527 = vmatprep.mubr.msk.f32.mxu0 %vm35_vm3, %v23_v20  ;;  %v27_v30 = vld [vmem:[%s903_s0 + $0x50] sm:$0xff]  ;;  %v624_v31 = vpack.c.bf16 %v260_v29, %v259_v28  ;;  %v28_v32 = vld [vmem:[%s903_s0 + $0x58] sm:$0xff]  ;;  %v261_v33 = vld [vmem:[%s905_s2 + $0x60] sm:$0xff] }
  0x12   :  { %615 = vmatpush3.bf16.msra.mxu0 %v612_v16  ;;  %646 = vmatpush3.bf16.msra.mxu1 %v612_v16  ;;  %v262_v34 = vld [vmem:[%s905_s2 + $0x68] sm:$0xff]  ;;  %v29_v35 = vld [vmem:[%s903_s0 + $0x60] sm:$0xff]  ;;  %v263_v38 = vld [vmem:[%s905_s2 + $0x70] sm:$0xff] }
  0x13   :  { %617 = vmatprep.subr.bf16.mxu0 %v616_v21  ;;  %639 = vmatprep.subr.bf16.mxu1 %v616_v21  ;;  %v628_v36 = vpack.c.bf16 %v262_v34, %v261_v33  ;;  %v30_v37 = vld [vmem:[%s903_s0 + $0x68] sm:$0xff]  ;;  %v264_v39 = vld [vmem:[%s905_s2 + $0x78] sm:$0xff]  ;;  %v31_v40 = vld [vmem:[%s903_s0 + $0x70] sm:$0xff] }
  0x14   :  { %528 = vmatmul.mubr.msk.f32.gmra.mrb[6].mxu0 %vm35_vm3, %v24_v22  ;;  %v632_v41 = vpack.c.bf16 %v264_v39, %v263_v38  ;;  %v32_v42 = vld [vmem:[%s903_s0 + $0x78] sm:$0xff]  ;;  %s681_s0 = smov [#allocation2]  }
  0x15   :  { %530 = vmatprep.mubr.msk.f32.mxu0 %vm35_vm3, %v25_v25  ;;  %s432_s2 = sshll.u32 %s681_s0, 4  ;;  %s433_s2 = int_to_ptr.vmem [resolvable:$true] %s432_s2 }
  0x16   :  { %619 = vmatpush3.bf16.msra.mxu0 %v616_v21  ;;  %647 = vmatpush3.bf16.msra.mxu1 %v616_v21  ;;  %s656_s28 = scalar_lea.vmem %s433_s2, 2048  ;;  %p661_p1 = scmp.lt.s32.totalorder %s433_s2, %s433_s2 }
  0x17   :  { %621 = vmatprep.subr.bf16.mxu0 %v620_v26  ;;  %640 = vmatprep.subr.bf16.mxu1 %v620_v26  ;;  %p657_p0 = scmp.ne.s32.totalorder %s433_s2, %s656_s28  ;;  %p662_p2 = scmp.lt.s32.totalorder %s656_s28, %s656_s28 }
  0x18   :  { %531 = vmatmul.mubr.msk.f32.gmra.mrb[8].mxu0 %vm35_vm3, %v26_v27 }
  0x19   :  { %533 = vmatprep.mubr.msk.f32.mxu0 %vm35_vm3, %v27_v30  ;;  %p663_p3 = por %p662_p2, %p661_p1 }
  0x1a   :  { %623 = vmatpush3.bf16.msra.mxu0 %v620_v26  ;;  %648 = vmatpush3.bf16.msra.mxu1 %v620_v26 }
  0x1b   :  { %625 = vmatprep.subr.bf16.mxu0 %v624_v31  ;;  %641 = vmatprep.subr.bf16.mxu1 %v624_v31  ;;  %p664_p4 = pnand %p663_p3, %p657_p0 }
  0x1c   :  { %534 = vmatmul.mubr.msk.f32.gmra.mrb[10].mxu0 %vm35_vm3, %v28_v32 }
  0x1d   :  { %536 = vmatprep.mubr.msk.f32.mxu0 %vm35_vm3, %v29_v35 }
  0x1e   :  { %627 = vmatpush3.bf16.msra.mxu0 %v624_v31  ;;  %649 = vmatpush3.bf16.msra.mxu1 %v624_v31 }
  0x1f   :  { %629 = vmatprep.subr.bf16.mxu0 %v628_v36  ;;  %642 = vmatprep.subr.bf16.mxu1 %v628_v36 }
  0x20   :  { %537 = vmatmul.mubr.msk.f32.gmra.mrb[12].mxu0 %vm35_vm3, %v30_v37 }
  0x21   :  { %539 = vmatprep.mubr.msk.f32.mxu0 %vm35_vm3, %v31_v40 }
  0x22   :  { %631 = vmatpush3.bf16.msra.mxu0 %v628_v36  ;;  %650 = vmatpush3.bf16.msra.mxu1 %v628_v36 }
  0x23   :  { %633 = vmatprep.subr.bf16.mxu0 %v632_v41  ;;  %643 = vmatprep.subr.bf16.mxu1 %v632_v41 }
  0x24   :  { %540 = vmatmul.mubr.msk.f32.gmra.mrb[14].mxu0 %vm35_vm3, %v32_v42 }
  0x26   :  { %635 = vmatpush3.bf16.msra.mxu0 %v632_v41  ;;  %651 = vmatpush3.bf16.msra.mxu1 %v632_v41 }
  0xdb   :  { %v520_v43 = vpop.f32.mrb[0].mxu0 }
  0xdc   :  { %234 = vst [vmem:[#allocation2 + $0x8] sm:$0xff] %v520_v43  ;;  %v154_v44 = vpop.f32.mrb[1].mxu0 }
  0xdd   :  { %233 = vst [vmem:[#allocation2] sm:$0xff] %v154_v44  ;;  %574 = vmatprep.mubr.f32.mxu0 %v154_v44 }
  0xde   :  { %575 = vmatmul.mubr.f32.vlgmr.msra.gmra.mrb[16].mxu0 %v520_v43 }
  0xdf   :  { %v523_v45 = vpop.f32.mrb[2].mxu0 }
  0xe0   :  { %236 = vst [vmem:[#allocation2 + $0x18] sm:$0xff] %v523_v45  ;;  %v164_v46 = vpop.f32.mrb[3].mxu0 }
  0xe1   :  { %235 = vst [vmem:[#allocation2 + $0x10] sm:$0xff] %v164_v46  ;;  %577 = vmatprep.mubr.f32.mxu0 %v164_v46 }
  0xe2   :  { %578 = vmatmul.mubr.f32.gmra.mrb[18].mxu0 %v523_v45 }
  0xe3   :  { %v526_v47 = vpop.f32.mrb[4].mxu0 }
  0xe4   :  { %238 = vst [vmem:[#allocation2 + $0x28] sm:$0xff] %v526_v47  ;;  %v174_v48 = vpop.f32.mrb[5].mxu0 }
  0xe5   :  { %237 = vst [vmem:[#allocation2 + $0x20] sm:$0xff] %v174_v48  ;;  %580 = vmatprep.mubr.f32.mxu0 %v174_v48 }
  0xe6   :  { %581 = vmatmul.mubr.f32.gmra.mrb[20].mxu0 %v526_v47 }
  0xe7   :  { %v529_v49 = vpop.f32.mrb[6].mxu0 }
  0xe8   :  { %240 = vst [vmem:[#allocation2 + $0x38] sm:$0xff] %v529_v49  ;;  %v184_v50 = vpop.f32.mrb[7].mxu0 }
  0xe9   :  { %239 = vst [vmem:[#allocation2 + $0x30] sm:$0xff] %v184_v50  ;;  %583 = vmatprep.mubr.f32.mxu1 %v184_v50 }
  0xea   :  { %584 = vmatmul.mubr.f32.vlgmr.msra.gmra.mrb[0].mxu1 %v529_v49 }
  0xeb   :  { %v532_v51 = vpop.f32.mrb[8].mxu0 }
  0xec   :  { %242 = vst [vmem:[#allocation2 + $0x48] sm:$0xff] %v532_v51  ;;  %v194_v52 = vpop.f32.mrb[9].mxu0 }
  0xed   :  { %241 = vst [vmem:[#allocation2 + $0x40] sm:$0xff] %v194_v52  ;;  %586 = vmatprep.mubr.f32.mxu1 %v194_v52 }
  0xee   :  { %587 = vmatmul.mubr.f32.gmra.mrb[2].mxu1 %v532_v51 }
  0xef   :  { %v535_v53 = vpop.f32.mrb[10].mxu0 }
  0xf0   :  { %244 = vst [vmem:[#allocation2 + $0x58] sm:$0xff] %v535_v53  ;;  %v204_v54 = vpop.f32.mrb[11].mxu0 }
  0xf1   :  { %243 = vst [vmem:[#allocation2 + $0x50] sm:$0xff] %v204_v54  ;;  %589 = vmatprep.mubr.f32.mxu1 %v204_v54 }
  0xf2   :  { %590 = vmatmul.mubr.f32.gmra.mrb[4].mxu1 %v535_v53 }
  0xf3   :  { %v538_v55 = vpop.f32.mrb[12].mxu0 }
  0xf4   :  { %246 = vst [vmem:[#allocation2 + $0x68] sm:$0xff] %v538_v55  ;;  %v214_v56 = vpop.f32.mrb[13].mxu0 }
  0xf5   :  { %245 = vst [vmem:[#allocation2 + $0x60] sm:$0xff] %v214_v56  ;;  %592 = vmatprep.mubr.f32.mxu1 %v214_v56 }
  0xf6   :  { %593 = vmatmul.mubr.f32.gmra.mrb[6].mxu1 %v538_v55 }
  0xf7   :  { %v541_v57 = vpop.f32.mrb[14].mxu0 }
  0xf8   :  { %248 = vst [vmem:[#allocation2 + $0x78] sm:$0xff] %v541_v57  ;;  %v224_v58 = vpop.f32.mrb[15].mxu0 }
  0xf9   :  { %247 = vst [vmem:[#allocation2 + $0x70] sm:$0xff] %v224_v58  ;;  %595 = vmatprep.mubr.f32.mxu1 %v224_v58 }
  0xfa   :  { %596 = vmatmul.mubr.f32.gmra.mrb[8].mxu1 %v541_v57 }
  0xfb   :  { %667 = shalt.err (!%p664_p4)
}
  0xfc   :  { %s668_s5 = scalar_lea.hbm %s906_s3, 2048 }
  0xfd   :  { %p669_p5 = scmp.ne.s32.totalorder %s906_s3, %s668_s5  ;;  %p672_p6 = scmp.lt.u32.totalorder %s668_s5, %s906_s3 }
  0xff   :  { %p674_p7 = pnand %p672_p6, %p669_p5 }
 0x101   :  { %677 = shalt.err (!%p674_p7)
}
 0x102   :  { %s682_s10 = smov 128   ;;  %s683_s11 = smov 8   ;;  %vm410_vm4 = vcmask 15360  }
 0x103   :  { %438 = dma.vmem_to_hbm [thread:$0]  %s433_s2, 2048, %s906_s3, [#allocation3], %s682_s10, %s682_s10, %s683_s11  }
 0x1b1   :  { %v576_v59 = vpop.f32.mrb[16].mxu0 }
 0x1b2   :  { %412 = vst.msk [vmem:[%s907_s4 + $0x8] sm:$0xff] %vm410_vm4, %v576_v59  ;;  %v331_v60 = vpop.f32.mrb[17].mxu0 }
 0x1b3   :  { %411 = vst.msk [vmem:[%s907_s4] sm:$0xff] %vm410_vm4, %v331_v60 }
 0x1b5   :  { %v579_v61 = vpop.f32.mrb[18].mxu0 }
 0x1b6   :  { %414 = vst.msk [vmem:[%s907_s4 + $0x18] sm:$0xff] %vm410_vm4, %v579_v61  ;;  %v341_v62 = vpop.f32.mrb[19].mxu0 }
 0x1b7   :  { %413 = vst.msk [vmem:[%s907_s4 + $0x10] sm:$0xff] %vm410_vm4, %v341_v62 }
 0x1b9   :  { %v582_v63 = vpop.f32.mrb[20].mxu0 }
 0x1ba   :  { %416 = vst.msk [vmem:[%s907_s4 + $0x28] sm:$0xff] %vm410_vm4, %v582_v63  ;;  %v351_v0 = vpop.f32.mrb[21].mxu0 }
 0x1bb   :  { %415 = vst.msk [vmem:[%s907_s4 + $0x20] sm:$0xff] %vm410_vm4, %v351_v0 }
 0x1bd   :  { %v585_v1 = vpop.f32.mrb[0].mxu1 }
 0x1be   :  { %418 = vst.msk [vmem:[%s907_s4 + $0x38] sm:$0xff] %vm410_vm4, %v585_v1  ;;  %v361_v2 = vpop.f32.mrb[1].mxu1 }
 0x1bf   :  { %417 = vst.msk [vmem:[%s907_s4 + $0x30] sm:$0xff] %vm410_vm4, %v361_v2 }
 0x1c1   :  { %v588_v3 = vpop.f32.mrb[2].mxu1 }
 0x1c2   :  { %420 = vst.msk [vmem:[%s907_s4 + $0x48] sm:$0xff] %vm410_vm4, %v588_v3  ;;  %v371_v4 = vpop.f32.mrb[3].mxu1 }
 0x1c3   :  { %419 = vst.msk [vmem:[%s907_s4 + $0x40] sm:$0xff] %vm410_vm4, %v371_v4 }
 0x1c5   :  { %v591_v5 = vpop.f32.mrb[4].mxu1 }
 0x1c6   :  { %422 = vst.msk [vmem:[%s907_s4 + $0x58] sm:$0xff] %vm410_vm4, %v591_v5  ;;  %v381_v6 = vpop.f32.mrb[5].mxu1 }
 0x1c7   :  { %421 = vst.msk [vmem:[%s907_s4 + $0x50] sm:$0xff] %vm410_vm4, %v381_v6 }
 0x1c9   :  { %v594_v7 = vpop.f32.mrb[6].mxu1 }
 0x1ca   :  { %424 = vst.msk [vmem:[%s907_s4 + $0x68] sm:$0xff] %vm410_vm4, %v594_v7  ;;  %v391_v8 = vpop.f32.mrb[7].mxu1 }
 0x1cb   :  { %423 = vst.msk [vmem:[%s907_s4 + $0x60] sm:$0xff] %vm410_vm4, %v391_v8 }
 0x1cd   :  { %v597_v9 = vpop.f32.mrb[8].mxu1 }
 0x1ce   :  { %426 = vst.msk [vmem:[%s907_s4 + $0x78] sm:$0xff] %vm410_vm4, %v597_v9  ;;  %v401_v10 = vpop.f32.mrb[9].mxu1 }
 0x1cf   :  { %425 = vst.msk [vmem:[%s907_s4 + $0x70] sm:$0xff] %vm410_vm4, %v401_v10 }
 0x1d0   :  { %678 = dma.done.wait [#allocation3], 2048  }
 0x1d1   :  { %679 = vsyncadd [#allocation3], 4294965248 }
 0x1d2   :  { %446 = vsyncpa [#allocation3], 1 }

</bundles_post_ra>
